<compile_context>
chip_gen: v7x
topology: tpu7x:2x2x1
jax: 0.10.0
libtpu: 0.0.40
codegen_flags: <defaults>
</compile_context>

<pallas_src>
import functools

import jax
import jax.numpy as jnp
import numpy as np
from jax.experimental import pallas as pl
from jax.experimental.pallas import tpu as pltpu


def _banded_conv_matrices(w_hwio, width):
    """3x3 HWIO conv weight -> 3 banded matmul matrices.

    Returns m of shape (3, (W+2)*Cin, W*Cout) such that, with the activation
    stored lane-dense as rows of length (W+2)*Cin (zero halo included),
        out_rows = sum_dy  act_rows[dy : dy+H, :] @ m[dy]
    equals the SAME-padded 3x3 convolution, out_rows[h, w*Cout+co] = out[h,w,co].
    Built once on the host/XLA side.
    """
    _, _, cin, cout = w_hwio.shape
    wp = jnp.arange(width + 2)[:, None]            # padded pixel column
    wo = jnp.arange(width)[None, :]                # output pixel column
    dx = wp - wo                                   # tap index (valid in 0..2)
    valid = (dx >= 0) & (dx < 3)
    taps = w_hwio[:, jnp.clip(dx, 0, 2)]           # (3, W+2, W, Cin, Cout)
    taps = jnp.where(valid[None, :, :, None, None], taps, 0.0)
    taps = jnp.transpose(taps, (0, 1, 3, 2, 4))    # (3, W+2, Cin, W, Cout)
    return taps.reshape(3, (width + 2) * cin, width * cout)


def _super_block_kernel(x_ref, m1_ref, b1_ref, m2_ref, b2_ref, o_ref,
                        xpad_ref, hpad_ref, *, H, W, C, n_layers):
    """All N basic blocks for one batch element, activations resident in VMEM.

    x_ref:   (1, H, W*C)            input rows (lane-dense)
    m*_ref:  (3, (W+2)*C, W*C)      banded conv weights (BN scale folded in)
    b*_ref:  (1, W*C)               folded BN bias, tiled across W
    o_ref:   (1, H, W*C)            output rows (lane-dense)
    xpad/hpad_ref: (H+2, (W+2)*C)   zero-padded VMEM scratch ('SAME' halo)
    """
    WC = W * C

    # Zero the padded scratch once; only the interior is written afterwards,
    # so the zero border provides 'SAME' conv padding for every layer.
    xpad_ref[...] = jnp.zeros_like(xpad_ref)
    hpad_ref[...] = jnp.zeros_like(hpad_ref)
    xpad_ref[pl.ds(1, H), pl.ds(C, WC)] = x_ref[0]

    # Loop-invariant bias broadcasts hoisted out of the (unrolled) layer loop.
    b1 = jnp.broadcast_to(b1_ref[...], (H, WC))
    b2 = jnp.broadcast_to(b2_ref[...], (H, WC))

    def conv3x3(src_ref, m_ref):
        # SAME 3x3 conv == 3 dense MXU matmuls over dy-shifted row strips.
        acc = jnp.dot(src_ref[pl.ds(0, H), :], m_ref[0],
                      preferred_element_type=jnp.float32)
        acc += jnp.dot(src_ref[pl.ds(1, H), :], m_ref[1],
                       preferred_element_type=jnp.float32)
        acc += jnp.dot(src_ref[pl.ds(2, H), :], m_ref[2],
                       preferred_element_type=jnp.float32)
        return acc

    # n_layers is a small static int -> unroll for full scheduler visibility.
    for _ in range(n_layers):
        residual = xpad_ref[pl.ds(1, H), pl.ds(C, WC)]

        # Stage 1: conv3x3 (BN scale folded into weights) + bias + ReLU
        h = jnp.maximum(conv3x3(xpad_ref, m1_ref) + b1, 0.0)
        hpad_ref[pl.ds(1, H), pl.ds(C, WC)] = h

        # Stage 2: conv3x3 + bias + residual + ReLU
        y = jnp.maximum(conv3x3(hpad_ref, m2_ref) + b2 + residual, 0.0)
        xpad_ref[pl.ds(1, H), pl.ds(C, WC)] = y

    o_ref[0] = xpad_ref[pl.ds(1, H), pl.ds(C, WC)]


def resnet_super_block(x_nchw, params, n_layers):
    """ResNetSuperBlock.forward: apply the (cloned) basic block N times."""
    x = jnp.transpose(x_nchw, (0, 2, 3, 1)).astype(jnp.float32)   # NCHW -> NHWC
    B, H, W, C = x.shape
    Cout = params["w1"].shape[-1]
    assert Cout == C, "residual connection requires Cin == Cout"

    # Fold eval-mode BN scale into the conv weights, then lay each conv out as
    # three banded (dy-shifted) matmul matrices.  Host/XLA side, once.
    w1f = params["w1"] * params["s1"].reshape(1, 1, 1, -1)
    w2f = params["w2"] * params["s2"].reshape(1, 1, 1, -1)
    m1 = _banded_conv_matrices(w1f, W)                       # (3, (W+2)*C, W*C)
    m2 = _banded_conv_matrices(w2f, W)
    b1 = jnp.tile(params["b1"].reshape(1, Cout), (1, W))     # (1, W*C)
    b2 = jnp.tile(params["b2"].reshape(1, Cout), (1, W))

    x_rows = x.reshape(B, H, W * C)                          # lane-dense rows

    out_rows = pl.pallas_call(
        functools.partial(_super_block_kernel, H=H, W=W, C=C,
                          n_layers=n_layers),
        out_shape=jax.ShapeDtypeStruct((B, H, W * Cout), jnp.float32),
        grid=(B,),
        in_specs=[
            pl.BlockSpec((1, H, W * C), lambda b: (b, 0, 0)),
            pl.BlockSpec((3, (W + 2) * C, W * Cout), lambda b: (0, 0, 0)),
            pl.BlockSpec((1, W * Cout), lambda b: (0, 0)),
            pl.BlockSpec((3, (W + 2) * C, W * Cout), lambda b: (0, 0, 0)),
            pl.BlockSpec((1, W * Cout), lambda b: (0, 0)),
        ],
        out_specs=pl.BlockSpec((1, H, W * Cout), lambda b: (b, 0, 0)),
        scratch_shapes=[
            pltpu.VMEM((H + 2, (W + 2) * C), jnp.float32),   # padded activation
            pltpu.VMEM((H + 2, (W + 2) * C), jnp.float32),   # padded intermediate
        ],
        compiler_params=pltpu.CompilerParams(
            dimension_semantics=("parallel",)),
    )(x_rows, m1, b1, m2, b2)

    out = out_rows.reshape(B, H, W, Cout)
    return jnp.transpose(out, (0, 3, 1, 2))                  # NHWC -> NCHW


def _reference_super_block(x_nchw, p, n_layers):
    """Pure-JAX reference (lax conv) for correctness checking."""
    def conv(x, w):
        return jax.lax.conv_general_dilated(
            x, w, window_strides=(1, 1), padding="SAME",
            dimension_numbers=("NHWC", "HWIO", "NHWC"))

    x = jnp.transpose(x_nchw, (0, 2, 3, 1))
    for _ in range(n_layers):
        h = jax.nn.relu(conv(x, p["w1"]) * p["s1"] + p["b1"])
        x = jax.nn.relu(conv(h, p["w2"]) * p["s2"] + p["b2"] + x)
    return jnp.transpose(x, (0, 3, 1, 2))


if __name__ == "__main__":
    B, C, H, W = 2, 4, 16, 16
    N_LAYERS = 3

    key = jax.random.PRNGKey(0)
    kx, kw1, kw2, ks1, kb1, ks2, kb2 = jax.random.split(key, 7)

    x_nchw = jax.random.normal(kx, (B, C, H, W), dtype=jnp.float32)

    # Deterministic parameters (one set, shared by all N cloned layers).
    params = dict(
        w1=0.1 * jax.random.normal(kw1, (3, 3, C, C), dtype=jnp.float32),
        s1=1.0 + 0.1 * jax.random.normal(ks1, (1, C), dtype=jnp.float32),
        b1=0.1 * jax.random.normal(kb1, (1, C), dtype=jnp.float32),
        w2=0.1 * jax.random.normal(kw2, (3, 3, C, C), dtype=jnp.float32),
        s2=1.0 + 0.1 * jax.random.normal(ks2, (1, C), dtype=jnp.float32),
        b2=0.1 * jax.random.normal(kb2, (1, C), dtype=jnp.float32),
    )

    out = jax.block_until_ready(resnet_super_block(x_nchw, params, N_LAYERS))
    ref = jax.block_until_ready(_reference_super_block(x_nchw, params, N_LAYERS))

    np.testing.assert_allclose(np.asarray(out), np.asarray(ref),
                               rtol=1e-4, atol=1e-4)
    print("KERNEL_OK")
</pallas_src>

<mosaic_0001>
module attributes {stable_mosaic.version = 11 : i64} {
  func.func @_super_block_kernel(%arg0: i32, %arg1: memref<1x16x64xf32, #tpu.memory_space<vmem>>, %arg2: memref<3x72x64xf32, #tpu.memory_space<vmem>>, %arg3: memref<1x64xf32, #tpu.memory_space<vmem>>, %arg4: memref<3x72x64xf32, #tpu.memory_space<vmem>>, %arg5: memref<1x64xf32, #tpu.memory_space<vmem>>, %arg6: memref<1x16x64xf32, #tpu.memory_space<vmem>>, %arg7: memref<18x72xf32, #tpu.memory_space<vmem>>, %arg8: memref<18x72xf32, #tpu.memory_space<vmem>>) attributes {dimension_semantics = [#tpu.dimension_semantics<parallel>], iteration_bounds = array<i64: 2>, scalar_prefetch = 0 : i64, scratch_operands = 2 : i64, tpu.core_type = #tpu.core_type<tc>, window_params = [{transform_indices = @transform_0, window_bounds = array<i64: 1, 16, 64>}, {pipeline_mode = #tpu.pipeline_mode<synchronous>, transform_indices = @transform_1, window_bounds = array<i64: 3, 72, 64>}, {pipeline_mode = #tpu.pipeline_mode<synchronous>, transform_indices = @transform_2, window_bounds = array<i64: 1, 64>}, {pipeline_mode = #tpu.pipeline_mode<synchronous>, transform_indices = @transform_3, window_bounds = array<i64: 3, 72, 64>}, {pipeline_mode = #tpu.pipeline_mode<synchronous>, transform_indices = @transform_4, window_bounds = array<i64: 1, 64>}, {transform_indices = @transform_5, window_bounds = array<i64: 1, 16, 64>}]} {
    %cst = arith.constant 0.000000e+00 : f32
    %0 = vector.broadcast %cst : f32 to vector<18x72xf32>
    %c0 = arith.constant 0 : index
    %c0_0 = arith.constant 0 : index
    %1 = vector.load %arg7[%c0, %c0_0] : memref<18x72xf32, #tpu.memory_space<vmem>>, vector<18x72xf32>
    tpu.vector_store %arg7[%c0, %c0_0], %0 {strides = array<i32>} : memref<18x72xf32, #tpu.memory_space<vmem>>, vector<18x72xf32>,
    %cst_1 = arith.constant 0.000000e+00 : f32
    %2 = vector.broadcast %cst_1 : f32 to vector<18x72xf32>
    %c0_2 = arith.constant 0 : index
    %c0_3 = arith.constant 0 : index
    %3 = vector.load %arg8[%c0_2, %c0_3] : memref<18x72xf32, #tpu.memory_space<vmem>>, vector<18x72xf32>
    tpu.vector_store %arg8[%c0_2, %c0_3], %2 {strides = array<i32>} : memref<18x72xf32, #tpu.memory_space<vmem>>, vector<18x72xf32>,
    %c0_4 = arith.constant 0 : index
    %c0_5 = arith.constant 0 : index
    %c0_6 = arith.constant 0 : index
    %4 = vector.load %arg1[%c0_4, %c0_5, %c0_6] : memref<1x16x64xf32, #tpu.memory_space<vmem>>, vector<1x16x64xf32>
    %5 = vector.shape_cast %4 : vector<1x16x64xf32> to vector<16x64xf32>
    %c1 = arith.constant 1 : index
    %c4 = arith.constant 4 : index
    %6 = vector.load %arg7[%c1, %c4] : memref<18x72xf32, #tpu.memory_space<vmem>>, vector<16x64xf32>
    tpu.vector_store %arg7[%c1, %c4], %5 {strides = array<i32>} : memref<18x72xf32, #tpu.memory_space<vmem>>, vector<16x64xf32>,
    %c0_7 = arith.constant 0 : index
    %c0_8 = arith.constant 0 : index
    %7 = vector.load %arg3[%c0_7, %c0_8] : memref<1x64xf32, #tpu.memory_space<vmem>>, vector<1x64xf32>
    %8 = vector.shape_cast %7 : vector<1x64xf32> to vector<1x64xf32>
    %9 = vector.broadcast %8 : vector<1x64xf32> to vector<16x64xf32>
    %c0_9 = arith.constant 0 : index
    %c0_10 = arith.constant 0 : index
    %10 = vector.load %arg5[%c0_9, %c0_10] : memref<1x64xf32, #tpu.memory_space<vmem>>, vector<1x64xf32>
    %11 = vector.shape_cast %10 : vector<1x64xf32> to vector<1x64xf32>
    %12 = vector.broadcast %11 : vector<1x64xf32> to vector<16x64xf32>
    %c1_11 = arith.constant 1 : index
    %c4_12 = arith.constant 4 : index
    %13 = vector.load %arg7[%c1_11, %c4_12] : memref<18x72xf32, #tpu.memory_space<vmem>>, vector<16x64xf32>
    %c0_13 = arith.constant 0 : index
    %c0_14 = arith.constant 0 : index
    %14 = vector.load %arg7[%c0_13, %c0_14] : memref<18x72xf32, #tpu.memory_space<vmem>>, vector<16x72xf32>
    %c0_15 = arith.constant 0 : index
    %c0_16 = arith.constant 0 : index
    %c0_17 = arith.constant 0 : index
    %15 = vector.load %arg2[%c0_15, %c0_16, %c0_17] : memref<3x72x64xf32, #tpu.memory_space<vmem>>, vector<1x72x64xf32>
    %16 = vector.shape_cast %15 : vector<1x72x64xf32> to vector<72x64xf32>
    %cst_18 = arith.constant dense<0.000000e+00> : vector<16x64xf32>
    %17 = tpu.matmul %14, %16, %cst_18 {dimension_numbers = #tpu.dot_dimension_numbers<[1], [0], [0], [1], [0, 0, 1, 1], [], []>} : vector<16x72xf32>, vector<72x64xf32>, vector<16x64xf32> -> vector<16x64xf32>
    %c1_19 = arith.constant 1 : index
    %c0_20 = arith.constant 0 : index
    %18 = vector.load %arg7[%c1_19, %c0_20] : memref<18x72xf32, #tpu.memory_space<vmem>>, vector<16x72xf32>
    %c1_21 = arith.constant 1 : index
    %c0_22 = arith.constant 0 : index
    %c0_23 = arith.constant 0 : index
    %19 = vector.load %arg2[%c1_21, %c0_22, %c0_23] : memref<3x72x64xf32, #tpu.memory_space<vmem>>, vector<1x72x64xf32>
    %20 = vector.shape_cast %19 : vector<1x72x64xf32> to vector<72x64xf32>
    %cst_24 = arith.constant dense<0.000000e+00> : vector<16x64xf32>
    %21 = tpu.matmul %18, %20, %cst_24 {dimension_numbers = #tpu.dot_dimension_numbers<[1], [0], [0], [1], [0, 0, 1, 1], [], []>} : vector<16x72xf32>, vector<72x64xf32>, vector<16x64xf32> -> vector<16x64xf32>
    %22 = arith.addf %17, %21 : vector<16x64xf32>
    %c2 = arith.constant 2 : index
    %c0_25 = arith.constant 0 : index
    %23 = vector.load %arg7[%c2, %c0_25] : memref<18x72xf32, #tpu.memory_space<vmem>>, vector<16x72xf32>
    %c2_26 = arith.constant 2 : index
    %c0_27 = arith.constant 0 : index
    %c0_28 = arith.constant 0 : index
    %24 = vector.load %arg2[%c2_26, %c0_27, %c0_28] : memref<3x72x64xf32, #tpu.memory_space<vmem>>, vector<1x72x64xf32>
    %25 = vector.shape_cast %24 : vector<1x72x64xf32> to vector<72x64xf32>
    %cst_29 = arith.constant dense<0.000000e+00> : vector<16x64xf32>
    %26 = tpu.matmul %23, %25, %cst_29 {dimension_numbers = #tpu.dot_dimension_numbers<[1], [0], [0], [1], [0, 0, 1, 1], [], []>} : vector<16x72xf32>, vector<72x64xf32>, vector<16x64xf32> -> vector<16x64xf32>
    %27 = arith.addf %22, %26 : vector<16x64xf32>
    %28 = arith.addf %27, %9 : vector<16x64xf32>
    %cst_30 = arith.constant 0.000000e+00 : f32
    %29 = vector.broadcast %cst_30 : f32 to vector<16x64xf32>
    %30 = arith.maximumf %28, %29 : vector<16x64xf32>
    %c1_31 = arith.constant 1 : index
    %c4_32 = arith.constant 4 : index
    %31 = vector.load %arg8[%c1_31, %c4_32] : memref<18x72xf32, #tpu.memory_space<vmem>>, vector<16x64xf32>
    tpu.vector_store %arg8[%c1_31, %c4_32], %30 {strides = array<i32>} : memref<18x72xf32, #tpu.memory_space<vmem>>, vector<16x64xf32>,
    %c0_33 = arith.constant 0 : index
    %c0_34 = arith.constant 0 : index
    %32 = vector.load %arg8[%c0_33, %c0_34] : memref<18x72xf32, #tpu.memory_space<vmem>>, vector<16x72xf32>
    %c0_35 = arith.constant 0 : index
    %c0_36 = arith.constant 0 : index
    %c0_37 = arith.constant 0 : index
    %33 = vector.load %arg4[%c0_35, %c0_36, %c0_37] : memref<3x72x64xf32, #tpu.memory_space<vmem>>, vector<1x72x64xf32>
    %34 = vector.shape_cast %33 : vector<1x72x64xf32> to vector<72x64xf32>
    %cst_38 = arith.constant dense<0.000000e+00> : vector<16x64xf32>
    %35 = tpu.matmul %32, %34, %cst_38 {dimension_numbers = #tpu.dot_dimension_numbers<[1], [0], [0], [1], [0, 0, 1, 1], [], []>} : vector<16x72xf32>, vector<72x64xf32>, vector<16x64xf32> -> vector<16x64xf32>
    %c1_39 = arith.constant 1 : index
    %c0_40 = arith.constant 0 : index
    %36 = vector.load %arg8[%c1_39, %c0_40] : memref<18x72xf32, #tpu.memory_space<vmem>>, vector<16x72xf32>
    %c1_41 = arith.constant 1 : index
    %c0_42 = arith.constant 0 : index
    %c0_43 = arith.constant 0 : index
    %37 = vector.load %arg4[%c1_41, %c0_42, %c0_43] : memref<3x72x64xf32, #tpu.memory_space<vmem>>, vector<1x72x64xf32>
    %38 = vector.shape_cast %37 : vector<1x72x64xf32> to vector<72x64xf32>
    %cst_44 = arith.constant dense<0.000000e+00> : vector<16x64xf32>
    %39 = tpu.matmul %36, %38, %cst_44 {dimension_numbers = #tpu.dot_dimension_numbers<[1], [0], [0], [1], [0, 0, 1, 1], [], []>} : vector<16x72xf32>, vector<72x64xf32>, vector<16x64xf32> -> vector<16x64xf32>
    %40 = arith.addf %35, %39 : vector<16x64xf32>
    %c2_45 = arith.constant 2 : index
    %c0_46 = arith.constant 0 : index
    %41 = vector.load %arg8[%c2_45, %c0_46] : memref<18x72xf32, #tpu.memory_space<vmem>>, vector<16x72xf32>
    %c2_47 = arith.constant 2 : index
    %c0_48 = arith.constant 0 : index
    %c0_49 = arith.constant 0 : index
    %42 = vector.load %arg4[%c2_47, %c0_48, %c0_49] : memref<3x72x64xf32, #tpu.memory_space<vmem>>, vector<1x72x64xf32>
    %43 = vector.shape_cast %42 : vector<1x72x64xf32> to vector<72x64xf32>
    %cst_50 = arith.constant dense<0.000000e+00> : vector<16x64xf32>
    %44 = tpu.matmul %41, %43, %cst_50 {dimension_numbers = #tpu.dot_dimension_numbers<[1], [0], [0], [1], [0, 0, 1, 1], [], []>} : vector<16x72xf32>, vector<72x64xf32>, vector<16x64xf32> -> vector<16x64xf32>
    %45 = arith.addf %40, %44 : vector<16x64xf32>
    %46 = arith.addf %45, %12 : vector<16x64xf32>
    %47 = arith.addf %46, %13 : vector<16x64xf32>
    %cst_51 = arith.constant 0.000000e+00 : f32
    %48 = vector.broadcast %cst_51 : f32 to vector<16x64xf32>
    %49 = arith.maximumf %47, %48 : vector<16x64xf32>
    %c1_52 = arith.constant 1 : index
    %c4_53 = arith.constant 4 : index
    %50 = vector.load %arg7[%c1_52, %c4_53] : memref<18x72xf32, #tpu.memory_space<vmem>>, vector<16x64xf32>
    tpu.vector_store %arg7[%c1_52, %c4_53], %49 {strides = array<i32>} : memref<18x72xf32, #tpu.memory_space<vmem>>, vector<16x64xf32>,
    %c1_54 = arith.constant 1 : index
    %c4_55 = arith.constant 4 : index
    %51 = vector.load %arg7[%c1_54, %c4_55] : memref<18x72xf32, #tpu.memory_space<vmem>>, vector<16x64xf32>
    %c0_56 = arith.constant 0 : index
    %c0_57 = arith.constant 0 : index
    %52 = vector.load %arg7[%c0_56, %c0_57] : memref<18x72xf32, #tpu.memory_space<vmem>>, vector<16x72xf32>
    %c0_58 = arith.constant 0 : index
    %c0_59 = arith.constant 0 : index
    %c0_60 = arith.constant 0 : index
    %53 = vector.load %arg2[%c0_58, %c0_59, %c0_60] : memref<3x72x64xf32, #tpu.memory_space<vmem>>, vector<1x72x64xf32>
    %54 = vector.shape_cast %53 : vector<1x72x64xf32> to vector<72x64xf32>
    %cst_61 = arith.constant dense<0.000000e+00> : vector<16x64xf32>
    %55 = tpu.matmul %52, %54, %cst_61 {dimension_numbers = #tpu.dot_dimension_numbers<[1], [0], [0], [1], [0, 0, 1, 1], [], []>} : vector<16x72xf32>, vector<72x64xf32>, vector<16x64xf32> -> vector<16x64xf32>
    %c1_62 = arith.constant 1 : index
    %c0_63 = arith.constant 0 : index
    %56 = vector.load %arg7[%c1_62, %c0_63] : memref<18x72xf32, #tpu.memory_space<vmem>>, vector<16x72xf32>
    %c1_64 = arith.constant 1 : index
    %c0_65 = arith.constant 0 : index
    %c0_66 = arith.constant 0 : index
    %57 = vector.load %arg2[%c1_64, %c0_65, %c0_66] : memref<3x72x64xf32, #tpu.memory_space<vmem>>, vector<1x72x64xf32>
    %58 = vector.shape_cast %57 : vector<1x72x64xf32> to vector<72x64xf32>
    %cst_67 = arith.constant dense<0.000000e+00> : vector<16x64xf32>
    %59 = tpu.matmul %56, %58, %cst_67 {dimension_numbers = #tpu.dot_dimension_numbers<[1], [0], [0], [1], [0, 0, 1, 1], [], []>} : vector<16x72xf32>, vector<72x64xf32>, vector<16x64xf32> -> vector<16x64xf32>
    %60 = arith.addf %55, %59 : vector<16x64xf32>
    %c2_68 = arith.constant 2 : index
    %c0_69 = arith.constant 0 : index
    %61 = vector.load %arg7[%c2_68, %c0_69] : memref<18x72xf32, #tpu.memory_space<vmem>>, vector<16x72xf32>
    %c2_70 = arith.constant 2 : index
    %c0_71 = arith.constant 0 : index
    %c0_72 = arith.constant 0 : index
    %62 = vector.load %arg2[%c2_70, %c0_71, %c0_72] : memref<3x72x64xf32, #tpu.memory_space<vmem>>, vector<1x72x64xf32>
    %63 = vector.shape_cast %62 : vector<1x72x64xf32> to vector<72x64xf32>
    %cst_73 = arith.constant dense<0.000000e+00> : vector<16x64xf32>
    %64 = tpu.matmul %61, %63, %cst_73 {dimension_numbers = #tpu.dot_dimension_numbers<[1], [0], [0], [1], [0, 0, 1, 1], [], []>} : vector<16x72xf32>, vector<72x64xf32>, vector<16x64xf32> -> vector<16x64xf32>
    %65 = arith.addf %60, %64 : vector<16x64xf32>
    %66 = arith.addf %65, %9 : vector<16x64xf32>
    %cst_74 = arith.constant 0.000000e+00 : f32
    %67 = vector.broadcast %cst_74 : f32 to vector<16x64xf32>
    %68 = arith.maximumf %66, %67 : vector<16x64xf32>
    %c1_75 = arith.constant 1 : index
    %c4_76 = arith.constant 4 : index
    %69 = vector.load %arg8[%c1_75, %c4_76] : memref<18x72xf32, #tpu.memory_space<vmem>>, vector<16x64xf32>
    tpu.vector_store %arg8[%c1_75, %c4_76], %68 {strides = array<i32>} : memref<18x72xf32, #tpu.memory_space<vmem>>, vector<16x64xf32>,
    %c0_77 = arith.constant 0 : index
    %c0_78 = arith.constant 0 : index
    %70 = vector.load %arg8[%c0_77, %c0_78] : memref<18x72xf32, #tpu.memory_space<vmem>>, vector<16x72xf32>
    %c0_79 = arith.constant 0 : index
    %c0_80 = arith.constant 0 : index
    %c0_81 = arith.constant 0 : index
    %71 = vector.load %arg4[%c0_79, %c0_80, %c0_81] : memref<3x72x64xf32, #tpu.memory_space<vmem>>, vector<1x72x64xf32>
    %72 = vector.shape_cast %71 : vector<1x72x64xf32> to vector<72x64xf32>
    %cst_82 = arith.constant dense<0.000000e+00> : vector<16x64xf32>
    %73 = tpu.matmul %70, %72, %cst_82 {dimension_numbers = #tpu.dot_dimension_numbers<[1], [0], [0], [1], [0, 0, 1, 1], [], []>} : vector<16x72xf32>, vector<72x64xf32>, vector<16x64xf32> -> vector<16x64xf32>
    %c1_83 = arith.constant 1 : index
    %c0_84 = arith.constant 0 : index
    %74 = vector.load %arg8[%c1_83, %c0_84] : memref<18x72xf32, #tpu.memory_space<vmem>>, vector<16x72xf32>
    %c1_85 = arith.constant 1 : index
    %c0_86 = arith.constant 0 : index
    %c0_87 = arith.constant 0 : index
    %75 = vector.load %arg4[%c1_85, %c0_86, %c0_87] : memref<3x72x64xf32, #tpu.memory_space<vmem>>, vector<1x72x64xf32>
    %76 = vector.shape_cast %75 : vector<1x72x64xf32> to vector<72x64xf32>
    %cst_88 = arith.constant dense<0.000000e+00> : vector<16x64xf32>
    %77 = tpu.matmul %74, %76, %cst_88 {dimension_numbers = #tpu.dot_dimension_numbers<[1], [0], [0], [1], [0, 0, 1, 1], [], []>} : vector<16x72xf32>, vector<72x64xf32>, vector<16x64xf32> -> vector<16x64xf32>
    %78 = arith.addf %73, %77 : vector<16x64xf32>
    %c2_89 = arith.constant 2 : index
    %c0_90 = arith.constant 0 : index
    %79 = vector.load %arg8[%c2_89, %c0_90] : memref<18x72xf32, #tpu.memory_space<vmem>>, vector<16x72xf32>
    %c2_91 = arith.constant 2 : index
    %c0_92 = arith.constant 0 : index
    %c0_93 = arith.constant 0 : index
    %80 = vector.load %arg4[%c2_91, %c0_92, %c0_93] : memref<3x72x64xf32, #tpu.memory_space<vmem>>, vector<1x72x64xf32>
    %81 = vector.shape_cast %80 : vector<1x72x64xf32> to vector<72x64xf32>
    %cst_94 = arith.constant dense<0.000000e+00> : vector<16x64xf32>
    %82 = tpu.matmul %79, %81, %cst_94 {dimension_numbers = #tpu.dot_dimension_numbers<[1], [0], [0], [1], [0, 0, 1, 1], [], []>} : vector<16x72xf32>, vector<72x64xf32>, vector<16x64xf32> -> vector<16x64xf32>
    %83 = arith.addf %78, %82 : vector<16x64xf32>
    %84 = arith.addf %83, %12 : vector<16x64xf32>
    %85 = arith.addf %84, %51 : vector<16x64xf32>
    %cst_95 = arith.constant 0.000000e+00 : f32
    %86 = vector.broadcast %cst_95 : f32 to vector<16x64xf32>
    %87 = arith.maximumf %85, %86 : vector<16x64xf32>
    %c1_96 = arith.constant 1 : index
    %c4_97 = arith.constant 4 : index
    %88 = vector.load %arg7[%c1_96, %c4_97] : memref<18x72xf32, #tpu.memory_space<vmem>>, vector<16x64xf32>
    tpu.vector_store %arg7[%c1_96, %c4_97], %87 {strides = array<i32>} : memref<18x72xf32, #tpu.memory_space<vmem>>, vector<16x64xf32>,
    %c1_98 = arith.constant 1 : index
    %c4_99 = arith.constant 4 : index
    %89 = vector.load %arg7[%c1_98, %c4_99] : memref<18x72xf32, #tpu.memory_space<vmem>>, vector<16x64xf32>
    %c0_100 = arith.constant 0 : index
    %c0_101 = arith.constant 0 : index
    %90 = vector.load %arg7[%c0_100, %c0_101] : memref<18x72xf32, #tpu.memory_space<vmem>>, vector<16x72xf32>
    %c0_102 = arith.constant 0 : index
    %c0_103 = arith.constant 0 : index
    %c0_104 = arith.constant 0 : index
    %91 = vector.load %arg2[%c0_102, %c0_103, %c0_104] : memref<3x72x64xf32, #tpu.memory_space<vmem>>, vector<1x72x64xf32>
    %92 = vector.shape_cast %91 : vector<1x72x64xf32> to vector<72x64xf32>
    %cst_105 = arith.constant dense<0.000000e+00> : vector<16x64xf32>
    %93 = tpu.matmul %90, %92, %cst_105 {dimension_numbers = #tpu.dot_dimension_numbers<[1], [0], [0], [1], [0, 0, 1, 1], [], []>} : vector<16x72xf32>, vector<72x64xf32>, vector<16x64xf32> -> vector<16x64xf32>
    %c1_106 = arith.constant 1 : index
    %c0_107 = arith.constant 0 : index
    %94 = vector.load %arg7[%c1_106, %c0_107] : memref<18x72xf32, #tpu.memory_space<vmem>>, vector<16x72xf32>
    %c1_108 = arith.constant 1 : index
    %c0_109 = arith.constant 0 : index
    %c0_110 = arith.constant 0 : index
    %95 = vector.load %arg2[%c1_108, %c0_109, %c0_110] : memref<3x72x64xf32, #tpu.memory_space<vmem>>, vector<1x72x64xf32>
    %96 = vector.shape_cast %95 : vector<1x72x64xf32> to vector<72x64xf32>
    %cst_111 = arith.constant dense<0.000000e+00> : vector<16x64xf32>
    %97 = tpu.matmul %94, %96, %cst_111 {dimension_numbers = #tpu.dot_dimension_numbers<[1], [0], [0], [1], [0, 0, 1, 1], [], []>} : vector<16x72xf32>, vector<72x64xf32>, vector<16x64xf32> -> vector<16x64xf32>
    %98 = arith.addf %93, %97 : vector<16x64xf32>
    %c2_112 = arith.constant 2 : index
    %c0_113 = arith.constant 0 : index
    %99 = vector.load %arg7[%c2_112, %c0_113] : memref<18x72xf32, #tpu.memory_space<vmem>>, vector<16x72xf32>
    %c2_114 = arith.constant 2 : index
    %c0_115 = arith.constant 0 : index
    %c0_116 = arith.constant 0 : index
    %100 = vector.load %arg2[%c2_114, %c0_115, %c0_116] : memref<3x72x64xf32, #tpu.memory_space<vmem>>, vector<1x72x64xf32>
    %101 = vector.shape_cast %100 : vector<1x72x64xf32> to vector<72x64xf32>
    %cst_117 = arith.constant dense<0.000000e+00> : vector<16x64xf32>
    %102 = tpu.matmul %99, %101, %cst_117 {dimension_numbers = #tpu.dot_dimension_numbers<[1], [0], [0], [1], [0, 0, 1, 1], [], []>} : vector<16x72xf32>, vector<72x64xf32>, vector<16x64xf32> -> vector<16x64xf32>
    %103 = arith.addf %98, %102 : vector<16x64xf32>
    %104 = arith.addf %103, %9 : vector<16x64xf32>
    %cst_118 = arith.constant 0.000000e+00 : f32
    %105 = vector.broadcast %cst_118 : f32 to vector<16x64xf32>
    %106 = arith.maximumf %104, %105 : vector<16x64xf32>
    %c1_119 = arith.constant 1 : index
    %c4_120 = arith.constant 4 : index
    %107 = vector.load %arg8[%c1_119, %c4_120] : memref<18x72xf32, #tpu.memory_space<vmem>>, vector<16x64xf32>
    tpu.vector_store %arg8[%c1_119, %c4_120], %106 {strides = array<i32>} : memref<18x72xf32, #tpu.memory_space<vmem>>, vector<16x64xf32>,
    %c0_121 = arith.constant 0 : index
    %c0_122 = arith.constant 0 : index
    %108 = vector.load %arg8[%c0_121, %c0_122] : memref<18x72xf32, #tpu.memory_space<vmem>>, vector<16x72xf32>
    %c0_123 = arith.constant 0 : index
    %c0_124 = arith.constant 0 : index
    %c0_125 = arith.constant 0 : index
    %109 = vector.load %arg4[%c0_123, %c0_124, %c0_125] : memref<3x72x64xf32, #tpu.memory_space<vmem>>, vector<1x72x64xf32>
    %110 = vector.shape_cast %109 : vector<1x72x64xf32> to vector<72x64xf32>
    %cst_126 = arith.constant dense<0.000000e+00> : vector<16x64xf32>
    %111 = tpu.matmul %108, %110, %cst_126 {dimension_numbers = #tpu.dot_dimension_numbers<[1], [0], [0], [1], [0, 0, 1, 1], [], []>} : vector<16x72xf32>, vector<72x64xf32>, vector<16x64xf32> -> vector<16x64xf32>
    %c1_127 = arith.constant 1 : index
    %c0_128 = arith.constant 0 : index
    %112 = vector.load %arg8[%c1_127, %c0_128] : memref<18x72xf32, #tpu.memory_space<vmem>>, vector<16x72xf32>
    %c1_129 = arith.constant 1 : index
    %c0_130 = arith.constant 0 : index
    %c0_131 = arith.constant 0 : index
    %113 = vector.load %arg4[%c1_129, %c0_130, %c0_131] : memref<3x72x64xf32, #tpu.memory_space<vmem>>, vector<1x72x64xf32>
    %114 = vector.shape_cast %113 : vector<1x72x64xf32> to vector<72x64xf32>
    %cst_132 = arith.constant dense<0.000000e+00> : vector<16x64xf32>
    %115 = tpu.matmul %112, %114, %cst_132 {dimension_numbers = #tpu.dot_dimension_numbers<[1], [0], [0], [1], [0, 0, 1, 1], [], []>} : vector<16x72xf32>, vector<72x64xf32>, vector<16x64xf32> -> vector<16x64xf32>
    %116 = arith.addf %111, %115 : vector<16x64xf32>
    %c2_133 = arith.constant 2 : index
    %c0_134 = arith.constant 0 : index
    %117 = vector.load %arg8[%c2_133, %c0_134] : memref<18x72xf32, #tpu.memory_space<vmem>>, vector<16x72xf32>
    %c2_135 = arith.constant 2 : index
    %c0_136 = arith.constant 0 : index
    %c0_137 = arith.constant 0 : index
    %118 = vector.load %arg4[%c2_135, %c0_136, %c0_137] : memref<3x72x64xf32, #tpu.memory_space<vmem>>, vector<1x72x64xf32>
    %119 = vector.shape_cast %118 : vector<1x72x64xf32> to vector<72x64xf32>
    %cst_138 = arith.constant dense<0.000000e+00> : vector<16x64xf32>
    %120 = tpu.matmul %117, %119, %cst_138 {dimension_numbers = #tpu.dot_dimension_numbers<[1], [0], [0], [1], [0, 0, 1, 1], [], []>} : vector<16x72xf32>, vector<72x64xf32>, vector<16x64xf32> -> vector<16x64xf32>
    %121 = arith.addf %116, %120 : vector<16x64xf32>
    %122 = arith.addf %121, %12 : vector<16x64xf32>
    %123 = arith.addf %122, %89 : vector<16x64xf32>
    %cst_139 = arith.constant 0.000000e+00 : f32
    %124 = vector.broadcast %cst_139 : f32 to vector<16x64xf32>
    %125 = arith.maximumf %123, %124 : vector<16x64xf32>
    %c1_140 = arith.constant 1 : index
    %c4_141 = arith.constant 4 : index
    %126 = vector.load %arg7[%c1_140, %c4_141] : memref<18x72xf32, #tpu.memory_space<vmem>>, vector<16x64xf32>
    tpu.vector_store %arg7[%c1_140, %c4_141], %125 {strides = array<i32>} : memref<18x72xf32, #tpu.memory_space<vmem>>, vector<16x64xf32>,
    %c1_142 = arith.constant 1 : index
    %c4_143 = arith.constant 4 : index
    %127 = vector.load %arg7[%c1_142, %c4_143] : memref<18x72xf32, #tpu.memory_space<vmem>>, vector<16x64xf32>
    %c0_144 = arith.constant 0 : index
    %c0_145 = arith.constant 0 : index
    %c0_146 = arith.constant 0 : index
    %128 = vector.load %arg6[%c0_144, %c0_145, %c0_146] : memref<1x16x64xf32, #tpu.memory_space<vmem>>, vector<1x16x64xf32>
    %129 = vector.shape_cast %128 : vector<1x16x64xf32> to vector<16x64xf32>
    %130 = vector.shape_cast %127 : vector<16x64xf32> to vector<1x16x64xf32>
    tpu.vector_store %arg6[%c0_144, %c0_145, %c0_146], %130 {strides = array<i32>} : memref<1x16x64xf32, #tpu.memory_space<vmem>>, vector<1x16x64xf32>,
    return
  }
  func.func @transform_0(%arg0: i32) -> (i32, i32, i32) {
    %c0_i32 = arith.constant 0 : i32
    %c0_i32_0 = arith.constant 0 : i32
    %c0_i32_1 = arith.constant 0 : i32
    return %arg0, %c0_i32, %c0_i32_0 : i32, i32, i32
  }
  func.func @transform_1(%arg0: i32) -> (i32, i32, i32) {
    %c0_i32 = arith.constant 0 : i32
    %c0_i32_0 = arith.constant 0 : i32
    %c0_i32_1 = arith.constant 0 : i32
    %c0_i32_2 = arith.constant 0 : i32
    return %c0_i32, %c0_i32_0, %c0_i32_1 : i32, i32, i32
  }
  func.func @transform_2(%arg0: i32) -> (i32, i32) {
    %c0_i32 = arith.constant 0 : i32
    %c0_i32_0 = arith.constant 0 : i32
    %c0_i32_1 = arith.constant 0 : i32
    return %c0_i32, %c0_i32_0 : i32, i32
  }
  func.func @transform_3(%arg0: i32) -> (i32, i32, i32) {
    %c0_i32 = arith.constant 0 : i32
    %c0_i32_0 = arith.constant 0 : i32
    %c0_i32_1 = arith.constant 0 : i32
    %c0_i32_2 = arith.constant 0 : i32
    return %c0_i32, %c0_i32_0, %c0_i32_1 : i32, i32, i32
  }
  func.func @transform_4(%arg0: i32) -> (i32, i32) {
    %c0_i32 = arith.constant 0 : i32
    %c0_i32_0 = arith.constant 0 : i32
    %c0_i32_1 = arith.constant 0 : i32
    return %c0_i32, %c0_i32_0 : i32, i32
  }
  func.func @transform_5(%arg0: i32) -> (i32, i32, i32) {
    %c0_i32 = arith.constant 0 : i32
    %c0_i32_0 = arith.constant 0 : i32
    %c0_i32_1 = arith.constant 0 : i32
    return %arg0, %c0_i32, %c0_i32_0 : i32, i32, i32
  }
}

</mosaic_0001>

<bundles_post_ra>
// kernel: tpu_custom_call.1
= control target key start
LH: loop header
LB: loop body
LE: loop exit
PB: predicated region body
PF: predicated region fallthrough
CT: control target
= control target key end

     0   :  { %10 = vsyncpa [#allocation5], 0  ;;  %s3926_s0 = inlined_call_operand.vmem [shape: f32[2,16,64], index: 0, kind: input, shape index: {}]   ;;  %s3927_s1 = inlined_call_operand.vmem [shape: f32[3,72,64], index: 1, kind: input, shape index: {}]   ;;  %s3928_s2 = inlined_call_operand.vmem [shape: f32[1,64], index: 2, kind: input, shape index: {}]   ;;  %s3929_s3 = inlined_call_operand.vmem [shape: f32[3,72,64], index: 3, kind: input, shape index: {}]   ;;  %s3930_s4 = inlined_call_operand.vmem [shape: f32[1,64], index: 4, kind: input, shape index: {}]   ;;  %s3931_s5 = inlined_call_operand.hbm [shape: f32[2,16,64], index: 5, kind: output, shape index: {}]  }
   0x1   :  { %12 = vsyncpa [#allocation5 + $0x1], 0  ;;  %s3319_s18 = smov 0   ;;  %s3321_s19 = smov 0  }
   0x2   :  { %s3323_s20 = smov 0   ;;  %s3325_s21 = smov 0  }
   0x3 LB: > { %s3340_s22 = sadd.s32 4294967295, %s3281_s21   ;;  %s2127_s23 = sadd.s32 4294967294, %s3281_s21   ;;  %s3281_s21 = sphi %s3325_s21, %s3937_s21   ;;  %s3277_s20 = sphi %s3323_s20, %s3936_s20   ;;  %s3273_s19 = sphi %s3321_s19, %s3935_s19   ;;  %s3269_s18 = sphi %s3319_s18, %s3934_s18  }
   0x4   : > { %s3344_s24 = sadd.s32 1, %s3281_s21   ;;  %s135_s25 = sadd.s32 1, %s3277_s20 }
   0x5   : > { %s132_s26 = ssub.s32 %s3281_s21, %s3344_s24  ;;  %p145_p0 = scmp.ne.s32.totalorder %s3277_s20, %s3273_s19 }
   0x6   : > { %p133_p1 = scmp.eq.s32.totalorder %s132_s26, 0  ;;  %p146_p2 = scmp.eq.s32.totalorder %s3340_s22, 1 }
   0x7   : > { %p151_p3 = scmp.ne.s32.totalorder %s3273_s19, %s3269_s18  ;;  %p152_p4 = scmp.eq.s32.totalorder %s2127_s23, 1 }
   0x8   : > { %s3355_s27 = scalar_select %p133_p1, %s3277_s20, %s135_s25  }
   0x9   : > { %p3357_p5 = por %p146_p2, %p145_p0  ;;  %p3361_p6 = por %p152_p4, %p151_p3 }
   0xa   : > { %p2130_p7 = scmp.ge.s32.totalorder %s3281_s21, 1  ;;  %p190_p8 = scmp.lt.s32.totalorder %s3281_s21, 3 }
   0xc   : > { %p191_p9 = pnand %p2130_p7, %p190_p8 }
   0xd   : > { %p218_p10 = scmp.lt.s32.totalorder (!%p191_p9), %s3340_s22, 1  ;;  %v2136_v0 = vld [vmem:[%s3927_s1 + $0x48] sm:$0xff] (!%p191_p9)  ;;  %v2137_v1 = vld [vmem:[%s3927_s1 + $0x50] sm:$0xff] (!%p191_p9)  ;;  %v2138_v2 = vld [vmem:[%s3927_s1 + $0x58] sm:$0xff] (!%p191_p9)  ;;  %vm223_vm0 = vcmask (!%p191_p9), 588800   ;;  %vm226_vm1 = vcmask (!%p191_p9), 582656  }
   0xe   : > { %194 = sbr.rel (%p191_p9) target bundleno = 2553 (0x9f9), region = 40  ;;  %v3377_v3 = vpack.c.bf16 (!%p191_p9), %v2137_v1, %v2136_v0  ;;  %v2139_v4 = vld [vmem:[%s3927_s1 + $0x60] sm:$0xff] (!%p191_p9)  ;;  %v3283_v6 = vmov (!%p191_p9), 0.0   ;;  %v2140_v7 = vld [vmem:[%s3927_s1 + $0x68] sm:$0xff] (!%p191_p9)  ;;  %v2141_v8 = vld [vmem:[%s3927_s1 + $0x70] sm:$0xff] (!%p191_p9)  ;;  %s3284_s10 = smov (!%p191_p9), 4  }
   0xf   : > { %v3383_v5 = vpack.c.bf16 (!%p191_p9), %v2139_v4, %v2138_v2  ;;  %224 = vst.msk [vmem:[#allocation2] sm:$0xff] (!%p191_p9), %vm223_vm0, %v3283_v6  ;;  %225 = vst.msk [vmem:[#allocation2 + $0x8] sm:$0xff] (!%p191_p9), %vm223_vm0, %v3283_v6  ;;  %v3401_v9 = vpack.c.bf16 (!%p191_p9), %v2141_v8, %v2140_v7  ;;  %v2142_v11 = vld [vmem:[%s3927_s1 + $0x78] sm:$0xff] (!%p191_p9)  ;;  %v2143_v12 = vld [vmem:[%s3927_s1 + $0x80] sm:$0xff] (!%p191_p9)  ;;  %vm241_vm2 = vcmask (!%p191_p9), 556064   ;;  %s215_s8 = sand.u32 (!%p191_p9), 1, %s3273_s19  }
  0x10   : > { %228 = vst.msk [vmem:[#allocation3] sm:$0xff] (!%p191_p9), %vm223_vm0, %v3283_v6  ;;  %229 = vst.msk [vmem:[#allocation3 + $0x8] sm:$0xff] (!%p191_p9), %vm223_vm0, %v3283_v6  ;;  %2864 = vmatprep.subr.bf16.mxu0 (!%p191_p9), %v3377_v3  ;;  %v3412_v14 = vpack.c.bf16 (!%p191_p9), %v2143_v12, %v2142_v11  ;;  %v3420_v15 = vld [vmem:[%s3927_s1 + $0x88] sm:$0xff] (!%p191_p9)  ;;  %v262_v16 = vld [vmem:[%s3927_s1] sm:$0xff] (!%p191_p9)  ;;  %s2131_s9 = sshll.u32 (!%p191_p9), %s215_s8, 4  ;;  %vm2048_vm3 = vcmask (!%p191_p9), 523264  }
  0x11   : > { %227 = vst.msk [vmem:[#allocation2 + $0x10] sm:$0x3] (!%p191_p9), %vm226_vm1, %v3283_v6  ;;  %230 = vst.msk [vmem:[#allocation3 + $0x10] sm:$0x3] (!%p191_p9), %vm226_vm1, %v3283_v6  ;;  %2866 = vmatpush3.bf16.msra.mxu0 (!%p191_p9), %v3377_v3  ;;  %v263_v17 = vld [vmem:[%s3927_s1 + $0x8] sm:$0xff] (!%p191_p9)  ;;  %v264_v22 = vld [vmem:[%s3927_s1 + $0x10] sm:$0xff] (!%p191_p9) }
  0x12   : > { %2868 = vmatprep.subr.bf16.mxu0 (!%p191_p9), %v3383_v5  ;;  %v3430_v18 = vpack.c.bf16 (!%p191_p9), %v263_v17, %v262_v16  ;;  %v265_v23 = vld [vmem:[%s3927_s1 + $0x18] sm:$0xff] (!%p191_p9)  ;;  %v266_v26 = vld [vmem:[%s3927_s1 + $0x20] sm:$0xff] (!%p191_p9)  ;;  %v267_v27 = vld [vmem:[%s3927_s1 + $0x28] sm:$0xff] (!%p191_p9)  ;;  %s217_s11 = scalar_lea.vmem (!%p191_p9), [#allocation4], %s2131_s9 }
  0x13   : > { %v3444_v24 = vpack.c.bf16 (!%p191_p9), %v265_v23, %v264_v22  ;;  %v3459_v29 = vpack.c.bf16 (!%p191_p9), %v267_v27, %v266_v26  ;;  %v268_v30 = vld [vmem:[%s3927_s1 + $0x30] sm:$0xff] (!%p191_p9)  ;;  %v269_v31 = vld [vmem:[%s3927_s1 + $0x38] sm:$0xff] (!%p191_p9)  ;;  %v3476_v33 = vld [vmem:[%s3927_s1 + $0x40] sm:$0xff] (!%p191_p9)  ;;  %s2065_s12 = sshll.u32 (!%p191_p9), %s217_s11, 4  ;;  %s3878_s12 = int_to_ptr.vmem [resolvable:$true] %s2065_s12 }
  0x14   : > { %v3469_v32 = vpack.c.bf16 (!%p191_p9), %v269_v31, %v268_v30  ;;  %v2149_v34 = vld [vmem:[%s3927_s1 + $0x90] sm:$0xff] (!%p191_p9)  ;;  %v2150_v35 = vld [vmem:[%s3927_s1 + $0x98] sm:$0xff] (!%p191_p9)  ;;  %v2151_v36 = vld [vmem:[%s3927_s1 + $0xa0] sm:$0xff] (!%p191_p9)  ;;  %s3219_s16 = scalar_lea.vmem (!%p191_p9), %s3878_s12, 256 }
  0x15   : > { %s219_s13 = scalar_select %p218_p10, %s3340_s22, 1  ;;  %2870 = vmatpush3.bf16.msra.mxu0 %v3383_v5  ;;  %v2152_v37 = vld [vmem:[%s3927_s1 + $0xa8] sm:$0xff]  ;;  %v3492_v38 = vpack.c.bf16 %v2150_v35, %v2149_v34  ;;  %v2153_v41 = vld [vmem:[%s3927_s1 + $0xb0] sm:$0xff]  ;;  %v2154_v42 = vld [vmem:[%s3927_s1 + $0xb8] sm:$0xff] }
  0x16   : > { %2872 = vmatprep.subr.bf16.mxu0 %v3401_v9  ;;  %v3494_v39 = vpack.c.bf16 %v2152_v37, %v2151_v36  ;;  %v3508_v44 = vpack.c.bf16 %v2154_v42, %v2153_v41  ;;  %v2155_v45 = vld [vmem:[%s3927_s1 + $0xc0] sm:$0xff]  ;;  %v2156_v46 = vld [vmem:[%s3927_s1 + $0xc8] sm:$0xff]  ;;  %v3525_v48 = vld [vmem:[%s3927_s1 + $0xd0] sm:$0xff]  ;;  %p3220_p11 = scmp.ne.s32.totalorder %s3878_s12, %s3219_s16 }
  0x17   : > { %s2285_s23 = sshll.u32 %s219_s13, 4  ;;  %v3518_v47 = vpack.c.bf16 %v2156_v46, %v2155_v45  ;;  %v2160_v50 = vld [vmem:[%s3929_s3 + $0x48] sm:$0xff]  ;;  %v2161_v51 = vld [vmem:[%s3929_s3 + $0x50] sm:$0xff]  ;;  %v2162_v52 = vld [vmem:[%s3929_s3 + $0x58] sm:$0xff]  ;;  %s2286_s13 = sshll.u32 %s3340_s22, 8 }
  0x18   : > { %s222_s30 = scalar_lea.vmem %s3926_s0, %s2285_s23  ;;  %v3551_v53 = vpack.c.bf16 %v2161_v51, %v2160_v50  ;;  %v2163_v54 = vld [vmem:[%s3929_s3 + $0x60] sm:$0xff]  ;;  %v2164_v56 = vld [vmem:[%s3929_s3 + $0x68] sm:$0xff]  ;;  %v2165_v57 = vld [vmem:[%s3929_s3 + $0x70] sm:$0xff]  ;;  %s3883_s15 = scalar_lea.hbm %s3931_s5, %s2286_s13 }
  0x19   : > { %v231_v10 = vld [vmem:[%s222_s30] sm:$0xff]  ;;  %v232_v13 = vld [vmem:[%s222_s30 + $0x8] sm:$0xff]  ;;  %2874 = vmatpush3.bf16.msra.mxu0 %v3401_v9  ;;  %s3285_s30 = smov 124   ;;  %v3556_v55 = vpack.c.bf16 %v2163_v54, %v2162_v52  ;;  %v3568_v58 = vpack.c.bf16 %v2165_v57, %v2164_v56  ;;  %v2166_v59 = vld [vmem:[%s3929_s3 + $0x78] sm:$0xff]  ;;  %p3221_p12 = pnand %p3220_p11, %p3357_p5 }
  0x1a   : > { %235 = vrot.lane.b32.xlu0 %v231_v10, %s3284_s10  ;;  %2876 = vmatprep.subr.bf16.mxu0 %v3412_v14  ;;  %v2167_v60 = vld [vmem:[%s3929_s3 + $0x80] sm:$0xff]  ;;  %v3590_v1 = vld [vmem:[%s3929_s3 + $0x88] sm:$0xff]  ;;  %v556_v17 = vld [vmem:[%s3929_s3 + $0x10] sm:$0xff]  ;;  %s3286_s22 = smov [#allocation4]  }
  0x1b   : > { %2912 = vmatprep.subr.bf16.mxu1 %v3551_v53  ;;  %v3578_v61 = vpack.c.bf16 %v2167_v60, %v2166_v59  ;;  %v3584_v62 = vld [vmem:[%s3928_s2] ss:$0 sm:$0xff]  ;;  %v555_v4 = vld [vmem:[%s3929_s3 + $0x8] sm:$0xff]  ;;  %v560_v27 = vld [vmem:[%s3929_s3 + $0x30] sm:$0xff]  ;;  %p3222_p13 = pneg %p3221_p12  ;;  %s3223_s17 = sshll.u32 %s3286_s22, 4  ;;  %s3224_s17 = int_to_ptr.vmem [resolvable:$false] %s3223_s17 }
  0x1c   : > { %2914 = vmatpush3.bf16.msra.mxu1 %v3551_v53  ;;  %v554_v2 = vld [vmem:[%s3929_s3] sm:$0xff]  ;;  %v559_v23 = vld [vmem:[%s3929_s3 + $0x28] sm:$0xff]  ;;  %v2173_v34 = vld [vmem:[%s3929_s3 + $0x90] sm:$0xff]  ;;  %s3225_s23 = scalar_lea.vmem %s3224_s17, 512  ;;  %p3226_p0 = scmp.lt.s32.totalorder %s3878_s12, %s3224_s17 }
  0x1d   : > { %2878 = vmatpush3.bf16.msra.mxu0 %v3412_v14  ;;  %2916 = vmatprep.subr.bf16.mxu1 %v3556_v55  ;;  %v3600_v7 = vpack.c.bf16 %v555_v4, %v554_v2  ;;  %v558_v22 = vld [vmem:[%s3929_s3 + $0x20] sm:$0xff]  ;;  %v2174_v35 = vld [vmem:[%s3929_s3 + $0x98] sm:$0xff]  ;;  %v2176_v37 = vld [vmem:[%s3929_s3 + $0xa8] sm:$0xff]  ;;  %p3227_p1 = scmp.lt.s32.totalorder %s3225_s23, %s3219_s16 }
  0x1e   : > { %237 = vrot.lane.b32.xlu0 %v232_v13, %s3284_s10  ;;  %2501 = vmatprep.subr.mxu0 %v3420_v15  ;;  %v3630_v26 = vpack.c.bf16 %v559_v23, %v558_v22  ;;  %v3647_v31 = vld [vmem:[%s3929_s3 + $0x40] sm:$0xff]  ;;  %v2178_v45 = vld [vmem:[%s3929_s3 + $0xb8] sm:$0xff]  ;;  %v2180_v51 = vld [vmem:[%s3929_s3 + $0xc8] sm:$0xff] }
  0x1f   : > { %v2175_v36 = vld [vmem:[%s3929_s3 + $0xa0] sm:$0xff]  ;;  %v3696_v54 = vld [vmem:[%s3929_s3 + $0xd0] sm:$0xff]  ;;  %p3228_p2 = por %p3227_p1, %p3226_p0 }
  0x20   : > { %2918 = vmatpush3.bf16.msra.mxu1 %v3556_v55  ;;  %v3665_v41 = vpack.c.bf16 %v2176_v37, %v2175_v36  ;;  %v2179_v50 = vld [vmem:[%s3929_s3 + $0xc0] sm:$0xff] }
  0x21   : > { %2502 = vmatpush3.msra.mxu0 %v3420_v15  ;;  %2920 = vmatprep.subr.bf16.mxu1 %v3568_v58  ;;  %v3689_v52 = vpack.c.bf16 %v2180_v51, %v2179_v50  ;;  %v3716_v57 = vld [vmem:[%s3930_s4] ss:$0 sm:$0xff]  ;;  %p3229_p3 = pnand %p3228_p2, %p3222_p13 }
  0x22   : > { %2880 = vmatprep.subr.bf16.mxu0 %v3430_v18 }
  0x24   : > { %2922 = vmatpush3.bf16.msra.mxu1 %v3568_v58 }
  0x25   : > { %2924 = vmatprep.subr.bf16.mxu1 %v3578_v61 }
  0x28   : > { %2926 = vmatpush3.bf16.msra.mxu1 %v3578_v61 }
  0x29   : > { %2564 = vmatprep.subr.mxu1 %v3590_v1 }
  0x2c   : > { %2565 = vmatpush3.msra.mxu1 %v3590_v1 }
  0x2d   : > { %2928 = vmatprep.subr.bf16.mxu1 %v3600_v7 }
  0x8c   : > { %v236_v19 = vpop.permute.xlu0 %235 }
  0x8d   : > { %242 = vst.msk [vmem:[#allocation2 + $0x1] sm:$0xff] %vm241_vm2, %v236_v19  ;;  %v557_v19 = vld [vmem:[%s3929_s3 + $0x18] sm:$0xff] }
  0x90   : > { %v238_v20 = vpop.permute.xlu0 %237 }
  0x91   : > { %243 = vst.msk [vmem:[#allocation2 + $0x9] sm:$0xff] %vm241_vm2, %v238_v20  ;;  %v3618_v20 = vpack.c.bf16 %v557_v19, %v556_v17 }
  0x94   : > { %v258_v21 = vld [vmem:[#allocation2 + $0x1] sm:$0xff] }
  0x95   : > { %834 = vrot.lane.b32.xlu0 %v258_v21, %s3285_s30  ;;  %2503 = vmatprep.mubr.msk.f32.mxu0 %vm223_vm0, %v258_v21  ;;  %v260_v28 = vld [vmem:[#allocation2] sm:$0xff] }
  0x98   : > { %v3446_v25 = vld [vmem:[#allocation2 + $0x9] sm:$0xff] }
  0x99   : > { %2504 = vmatmul.mubr.msk.f32.vlgmr.msra.gmra.mrb[0].mxu0 %vm223_vm0, %v3446_v25  ;;  %v261_v40 = vld [vmem:[#allocation2 + $0x8] sm:$0xff] }
  0x9a   : > { %2882 = vmatpush3.bf16.msra.mxu0 %v3430_v18  ;;  %2524 = vmatprep.mubr.msk.f32.mxu0 %vm223_vm0, %v260_v28  ;;  %v443_v43 = vld [vmem:[#allocation2 + $0x2] sm:$0xff]  ;;  %v444_v49 = vld [vmem:[#allocation2 + $0xa] sm:$0xff]  ;;  %v561_v28 = vld [vmem:[%s3929_s3 + $0x38] sm:$0xff] }
  0x9b   : > { %2884 = vmatprep.subr.bf16.mxu0 %v3444_v24  ;;  %v3640_v30 = vpack.c.bf16 %v561_v28, %v560_v27 }
  0x9e   : > { %2886 = vmatpush3.bf16.msra.mxu0 %v3444_v24 }
  0x9f   : > { %2888 = vmatprep.subr.bf16.mxu0 %v3459_v29 }
  0xa2   : > { %2890 = vmatpush3.bf16.msra.mxu0 %v3459_v29 }
  0xa3   : > { %2892 = vmatprep.subr.bf16.mxu0 %v3469_v32 }
  0xa6   : > { %2894 = vmatpush3.bf16.msra.mxu0 %v3469_v32 }
  0xa7   : > { %2522 = vmatprep.subr.mxu0 %v3476_v33 }
  0xaa   : > { %2523 = vmatpush3.msra.mxu0 %v3476_v33 }
  0xab   : > { %2525 = vmatmul.mubr.msk.f32.vlgmr.msra.gmra.mrb[0].mxu0 %vm223_vm0, %v261_v40  ;;  %2896 = vmatprep.subr.bf16.mxu0 %v3492_v38  ;;  %v3663_v40 = vpack.c.bf16 %v2174_v35, %v2173_v34 }
  0xac   : > { %2898 = vmatpush3.bf16.msra.mxu0 %v3492_v38  ;;  %2545 = vmatprep.mubr.msk.f32.mxu0 %vm223_vm0, %v443_v43  ;;  %v2177_v43 = vld [vmem:[%s3929_s3 + $0xb0] sm:$0xff] }
  0xad   : > { %2900 = vmatprep.subr.bf16.mxu0 %v3494_v39 }
  0xb0   : > { %2902 = vmatpush3.bf16.msra.mxu0 %v3494_v39 }
  0xb1   : > { %2904 = vmatprep.subr.bf16.mxu0 %v3508_v44 }
  0xb4   : > { %2906 = vmatpush3.bf16.msra.mxu0 %v3508_v44 }
  0xb5   : > { %2908 = vmatprep.subr.bf16.mxu0 %v3518_v47 }
  0xb8   : > { %2910 = vmatpush3.bf16.msra.mxu0 %v3518_v47 }
  0xb9   : > { %2543 = vmatprep.subr.mxu0 %v3525_v48 }
  0xbc   : > { %2544 = vmatpush3.msra.mxu0 %v3525_v48 }
  0xbd   : > { %2546 = vmatmul.mubr.msk.f32.vlgmr.msra.gmra.mrb[0].mxu0 %vm223_vm0, %v444_v49  ;;  %2960 = vmatprep.subr.bf16.mxu0 %v3377_v3  ;;  %v3679_v49 = vpack.c.bf16 %v2178_v45, %v2177_v43 }
  0xbe   : > { %2962 = vmatpush3.bf16.msra.mxu0 %v3377_v3 }
  0xbf   : > { %2964 = vmatprep.subr.bf16.mxu0 %v3383_v5 }
  0xc2   : > { %2966 = vmatpush3.bf16.msra.mxu0 %v3383_v5 }
  0xc3   : > { %2968 = vmatprep.subr.bf16.mxu0 %v3401_v9 }
  0xc6   : > { %2970 = vmatpush3.bf16.msra.mxu0 %v3401_v9 }
  0xc7   : > { %2972 = vmatprep.subr.bf16.mxu0 %v3412_v14 }
  0xca   : > { %2974 = vmatpush3.bf16.msra.mxu0 %v3412_v14 }
  0xcb   : > { %2627 = vmatprep.subr.mxu0 %v3420_v15 }
  0xce   : > { %2628 = vmatpush3.msra.mxu0 %v3420_v15 }
  0xcf   : > { %2976 = vmatprep.subr.bf16.mxu0 %v3430_v18 }
 0x107   : > { %v835_v4 = vpop.permute.xlu0 %834 }
 0x190   : > { %v2547_v63 = vpop.f32.mrb[0].mxu0 }
 0x191   : > { %v527_v0 = vpop.f32.mrb[1].mxu0  ;;  %v539_v8 = vadd.f32 %v2547_v63, %v3584_v62 }
 0x192   : > { %v538_v6 = vadd.f32 %v3584_v62, %v527_v0 }
 0x193   : > { %v541_v11 = vmax.f32 %v539_v8, 0.0 }
 0x194   : > { %v540_v10 = vmax.f32 %v538_v6, 0.0 }
 0x196   : > { %544 = vrot.lane.b32.xlu1 %v540_v10, %s3284_s10 }
 0x19a   : > { %546 = vrot.lane.b32.xlu1 %v541_v11, %s3284_s10 }
 0x19e   : > { %836 = vrot.lane.b32.xlu1 %v3446_v25, %s3285_s30 }
 0x208   : > { %v545_v12 = vpop.permute.xlu1 %544 }
 0x209   : > { %550 = vst.msk [vmem:[#allocation3 + $0x1] sm:$0xff] %vm241_vm2, %v545_v12 }
 0x20c   : > { %v547_v13 = vpop.permute.xlu1 %546 }
 0x20d   : > { %551 = vst.msk [vmem:[#allocation3 + $0x9] sm:$0xff] %vm241_vm2, %v547_v13 }
 0x210   : > { %v563_v16 = vld [vmem:[#allocation3 + $0x1] sm:$0xff]  ;;  %v837_v0 = vpop.permute.xlu1 %836 }
 0x211   : > { %2566 = vmatprep.mubr.msk.f32.mxu1 %vm223_vm0, %v563_v16  ;;  %v552_v25 = vld [vmem:[#allocation3] sm:$0xff] }
 0x214   : > { %v564_v21 = vld [vmem:[#allocation3 + $0x9] sm:$0xff] }
 0x215   : > { %2567 = vmatmul.mubr.msk.f32.vlgmr.msra.gmra.mrb[0].mxu1 %vm223_vm0, %v564_v21  ;;  %v553_v42 = vld [vmem:[#allocation3 + $0x8] sm:$0xff] }
 0x216   : > { %2930 = vmatpush3.bf16.msra.mxu1 %v3600_v7  ;;  %2587 = vmatprep.mubr.msk.f32.mxu1 %vm223_vm0, %v552_v25  ;;  %v737_v46 = vld [vmem:[#allocation3 + $0x2] sm:$0xff]  ;;  %v738_v56 = vld [vmem:[#allocation3 + $0xa] sm:$0xff] }
 0x217   : > { %2932 = vmatprep.subr.bf16.mxu1 %v3618_v20 }
 0x21a   : > { %2934 = vmatpush3.bf16.msra.mxu1 %v3618_v20 }
 0x21b   : > { %2936 = vmatprep.subr.bf16.mxu1 %v3630_v26 }
 0x21e   : > { %2938 = vmatpush3.bf16.msra.mxu1 %v3630_v26 }
 0x21f   : > { %2940 = vmatprep.subr.bf16.mxu1 %v3640_v30 }
 0x222   : > { %2942 = vmatpush3.bf16.msra.mxu1 %v3640_v30 }
 0x223   : > { %2585 = vmatprep.subr.mxu1 %v3647_v31 }
 0x226   : > { %2586 = vmatpush3.msra.mxu1 %v3647_v31 }
 0x227   : > { %2588 = vmatmul.mubr.msk.f32.vlgmr.msra.gmra.mrb[0].mxu1 %vm223_vm0, %v553_v42  ;;  %2944 = vmatprep.subr.bf16.mxu1 %v3663_v40 }
 0x228   : > { %2946 = vmatpush3.bf16.msra.mxu1 %v3663_v40  ;;  %2608 = vmatprep.mubr.msk.f32.mxu1 %vm223_vm0, %v737_v46 }
 0x229   : > { %2948 = vmatprep.subr.bf16.mxu1 %v3665_v41 }
 0x22c   : > { %2950 = vmatpush3.bf16.msra.mxu1 %v3665_v41 }
 0x22d   : > { %2952 = vmatprep.subr.bf16.mxu1 %v3679_v49 }
 0x230   : > { %2954 = vmatpush3.bf16.msra.mxu1 %v3679_v49 }
 0x231   : > { %2956 = vmatprep.subr.bf16.mxu1 %v3689_v52 }
 0x234   : > { %2958 = vmatpush3.bf16.msra.mxu1 %v3689_v52 }
 0x235   : > { %2606 = vmatprep.subr.mxu1 %v3696_v54 }
 0x238   : > { %2607 = vmatpush3.msra.mxu1 %v3696_v54 }
 0x239   : > { %2609 = vmatmul.mubr.msk.f32.vlgmr.msra.gmra.mrb[0].mxu1 %vm223_vm0, %v738_v56  ;;  %3008 = vmatprep.subr.bf16.mxu1 %v3551_v53 }
 0x23a   : > { %3010 = vmatpush3.bf16.msra.mxu1 %v3551_v53 }
 0x23b   : > { %3012 = vmatprep.subr.bf16.mxu1 %v3556_v55 }
 0x23e   : > { %3014 = vmatpush3.bf16.msra.mxu1 %v3556_v55 }
 0x23f   : > { %3016 = vmatprep.subr.bf16.mxu1 %v3568_v58 }
 0x242   : > { %3018 = vmatpush3.bf16.msra.mxu1 %v3568_v58 }
 0x243   : > { %3020 = vmatprep.subr.bf16.mxu1 %v3578_v61 }
 0x246   : > { %3022 = vmatpush3.bf16.msra.mxu1 %v3578_v61 }
 0x247   : > { %2690 = vmatprep.subr.mxu1 %v3590_v1 }
 0x24a   : > { %2691 = vmatpush3.msra.mxu1 %v3590_v1 }
 0x24b   : > { %3024 = vmatprep.subr.bf16.mxu1 %v3600_v7 }
 0x30c   : > { %v2610_v59 = vpop.f32.mrb[0].mxu1 }
 0x30d   : > { %v833_v60 = vadd.f32 %v2610_v59, %v3716_v57  ;;  %v821_v63 = vpop.f32.mrb[1].mxu1 }
 0x30e   : > { %v832_v2 = vadd.f32 %v3716_v57, %v821_v63 }
 0x30f   : > { %v841_v6 = vadd.f32 %v837_v0, %v833_v60 }
 0x310   : > { %v840_v8 = vadd.f32 %v835_v4, %v832_v2 }
 0x311   : > { %v843_v10 = vmax.f32 %v841_v6, 0.0 }
 0x312   : > { %v842_v11 = vmax.f32 %v840_v8, 0.0 }
 0x313   : > { %848 = vrot.lane.b32.xlu1 %v843_v10, %s3284_s10 }
 0x314   : > { %846 = vrot.lane.b32.xlu0 %v842_v11, %s3284_s10 }
 0x385   : > { %v849_v12 = vpop.permute.xlu1 %848 }
 0x386   : > { %853 = vst.msk [vmem:[#allocation2 + $0x9] sm:$0xff] %vm241_vm2, %v849_v12  ;;  %v847_v13 = vpop.permute.xlu0 %846 }
 0x387   : > { %852 = vst.msk [vmem:[#allocation2 + $0x1] sm:$0xff] %vm241_vm2, %v847_v13 }
 0x38d   : > { %v855_v17 = vld [vmem:[#allocation2 + $0x9] sm:$0xff] }
 0x38e   : > { %v854_v16 = vld [vmem:[#allocation2 + $0x1] sm:$0xff]  ;;  %v1039_v23 = vld [vmem:[#allocation2 + $0xa] sm:$0xff] }
 0x38f   : > { %2629 = vmatprep.mubr.msk.f32.mxu0 %vm223_vm0, %v854_v16  ;;  %v856_v19 = vld [vmem:[#allocation2] sm:$0xff]  ;;  %v857_v21 = vld [vmem:[#allocation2 + $0x8] sm:$0xff] }
 0x390   : > { %2630 = vmatmul.mubr.msk.f32.vlgmr.msra.gmra.mrb[2].mxu0 %vm223_vm0, %v855_v17  ;;  %v1038_v22 = vld [vmem:[#allocation2 + $0x2] sm:$0xff] }
 0x391   : > { %2978 = vmatpush3.bf16.msra.mxu0 %v3430_v18  ;;  %2650 = vmatprep.mubr.msk.f32.mxu0 %vm223_vm0, %v856_v19 }
 0x392   : > { %2980 = vmatprep.subr.bf16.mxu0 %v3444_v24 }
 0x395   : > { %2982 = vmatpush3.bf16.msra.mxu0 %v3444_v24 }
 0x396   : > { %2984 = vmatprep.subr.bf16.mxu0 %v3459_v29 }
 0x399   : > { %2986 = vmatpush3.bf16.msra.mxu0 %v3459_v29 }
 0x39a   : > { %2988 = vmatprep.subr.bf16.mxu0 %v3469_v32 }
 0x39d   : > { %2990 = vmatpush3.bf16.msra.mxu0 %v3469_v32 }
 0x39e   : > { %2648 = vmatprep.subr.mxu0 %v3476_v33 }
 0x3a1   : > { %2649 = vmatpush3.msra.mxu0 %v3476_v33 }
 0x3a2   : > { %2651 = vmatmul.mubr.msk.f32.vlgmr.msra.gmra.mrb[2].mxu0 %vm223_vm0, %v857_v21  ;;  %2992 = vmatprep.subr.bf16.mxu0 %v3492_v38 }
 0x3a3   : > { %2994 = vmatpush3.bf16.msra.mxu0 %v3492_v38  ;;  %2671 = vmatprep.mubr.msk.f32.mxu0 %vm223_vm0, %v1038_v22 }
 0x3a4   : > { %2996 = vmatprep.subr.bf16.mxu0 %v3494_v39 }
 0x3a7   : > { %2998 = vmatpush3.bf16.msra.mxu0 %v3494_v39 }
 0x3a8   : > { %3000 = vmatprep.subr.bf16.mxu0 %v3508_v44 }
 0x3ab   : > { %3002 = vmatpush3.bf16.msra.mxu0 %v3508_v44 }
 0x3ac   : > { %3004 = vmatprep.subr.bf16.mxu0 %v3518_v47 }
 0x3af   : > { %3006 = vmatpush3.bf16.msra.mxu0 %v3518_v47 }
 0x3b0   : > { %2669 = vmatprep.subr.mxu0 %v3525_v48 }
 0x3b3   : > { %2670 = vmatpush3.msra.mxu0 %v3525_v48 }
 0x3b4   : > { %2672 = vmatmul.mubr.msk.f32.vlgmr.msra.gmra.mrb[2].mxu0 %vm223_vm0, %v1039_v23  ;;  %3056 = vmatprep.subr.bf16.mxu0 %v3377_v3 }
 0x3b5   : > { %3058 = vmatpush3.bf16.msra.mxu0 %v3377_v3 }
 0x3b6   : > { %3060 = vmatprep.subr.bf16.mxu0 %v3383_v5 }
 0x3b9   : > { %3062 = vmatpush3.bf16.msra.mxu0 %v3383_v5 }
 0x3ba   : > { %3064 = vmatprep.subr.bf16.mxu0 %v3401_v9 }
 0x3bd   : > { %3066 = vmatpush3.bf16.msra.mxu0 %v3401_v9 }
 0x3be   : > { %3068 = vmatprep.subr.bf16.mxu0 %v3412_v14 }
 0x3c1   : > { %3070 = vmatpush3.bf16.msra.mxu0 %v3412_v14 }
 0x3c2   : > { %2753 = vmatprep.subr.mxu0 %v3420_v15 }
 0x3c5   : > { %2754 = vmatpush3.msra.mxu0 %v3420_v15 }
 0x3c6   : > { %3072 = vmatprep.subr.bf16.mxu0 %v3430_v18 }
 0x487   : > { %v2673_v25 = vpop.f32.mrb[2].mxu0 }
 0x488   : > { %v1133_v3 = vadd.f32 %v2673_v25, %v3584_v62  ;;  %v1121_v27 = vpop.f32.mrb[3].mxu0 }
 0x489   : > { %v1132_v5 = vadd.f32 %v3584_v62, %v1121_v27 }
 0x48a   : > { %v1135_v28 = vmax.f32 %v1133_v3, 0.0 }
 0x48b   : > { %v1134_v34 = vmax.f32 %v1132_v5, 0.0 }
 0x48c   : > { %1140 = vrot.lane.b32.xlu1 %v1135_v28, %s3284_s10 }
 0x48d   : > { %1138 = vrot.lane.b32.xlu0 %v1134_v34, %s3284_s10 }
 0x490   : > { %1428 = vrot.lane.b32.xlu1 %v855_v17, %s3285_s30 }
 0x491   : > { %1426 = vrot.lane.b32.xlu0 %v854_v16, %s3285_s30 }
 0x4fe   : > { %v1141_v9 = vpop.permute.xlu1 %1140 }
 0x4ff   : > { %1145 = vst.msk [vmem:[#allocation3 + $0x9] sm:$0xff] %vm241_vm2, %v1141_v9  ;;  %v1139_v14 = vpop.permute.xlu0 %1138 }
 0x500   : > { %1144 = vst.msk [vmem:[#allocation3 + $0x1] sm:$0xff] %vm241_vm2, %v1139_v14 }
 0x502   : > { %v1429_v50 = vpop.permute.xlu1 %1428 }
 0x503   : > { %v1427_v51 = vpop.permute.xlu0 %1426 }
 0x506   : > { %v1158_v35 = vld [vmem:[#allocation3 + $0x9] sm:$0xff] }
 0x507   : > { %v1157_v15 = vld [vmem:[#allocation3 + $0x1] sm:$0xff]  ;;  %v1331_v43 = vld [vmem:[#allocation3 + $0xa] sm:$0xff] }
 0x508   : > { %2692 = vmatprep.mubr.msk.f32.mxu1 %vm223_vm0, %v1157_v15  ;;  %v1146_v36 = vld [vmem:[#allocation3] sm:$0xff]  ;;  %v1147_v37 = vld [vmem:[#allocation3 + $0x8] sm:$0xff] }
 0x509   : > { %2693 = vmatmul.mubr.msk.f32.vlgmr.msra.gmra.mrb[2].mxu1 %vm223_vm0, %v1158_v35  ;;  %v1330_v42 = vld [vmem:[#allocation3 + $0x2] sm:$0xff] }
 0x50a   : > { %3026 = vmatpush3.bf16.msra.mxu1 %v3600_v7  ;;  %2713 = vmatprep.mubr.msk.f32.mxu1 %vm223_vm0, %v1146_v36 }
 0x50b   : > { %3028 = vmatprep.subr.bf16.mxu1 %v3618_v20 }
 0x50e   : > { %3030 = vmatpush3.bf16.msra.mxu1 %v3618_v20 }
 0x50f   : > { %3032 = vmatprep.subr.bf16.mxu1 %v3630_v26 }
 0x512   : > { %3034 = vmatpush3.bf16.msra.mxu1 %v3630_v26 }
 0x513   : > { %3036 = vmatprep.subr.bf16.mxu1 %v3640_v30 }
 0x516   : > { %3038 = vmatpush3.bf16.msra.mxu1 %v3640_v30 }
 0x517   : > { %2711 = vmatprep.subr.mxu1 %v3647_v31 }
 0x51a   : > { %2712 = vmatpush3.msra.mxu1 %v3647_v31 }
 0x51b   : > { %2714 = vmatmul.mubr.msk.f32.vlgmr.msra.gmra.mrb[2].mxu1 %vm223_vm0, %v1147_v37  ;;  %3040 = vmatprep.subr.bf16.mxu1 %v3663_v40 }
 0x51c   : > { %3042 = vmatpush3.bf16.msra.mxu1 %v3663_v40  ;;  %2734 = vmatprep.mubr.msk.f32.mxu1 %vm223_vm0, %v1330_v42 }
 0x51d   : > { %3044 = vmatprep.subr.bf16.mxu1 %v3665_v41 }
 0x520   : > { %3046 = vmatpush3.bf16.msra.mxu1 %v3665_v41 }
 0x521   : > { %3048 = vmatprep.subr.bf16.mxu1 %v3679_v49 }
 0x524   : > { %3050 = vmatpush3.bf16.msra.mxu1 %v3679_v49 }
 0x525   : > { %3052 = vmatprep.subr.bf16.mxu1 %v3689_v52 }
 0x528   : > { %3054 = vmatpush3.bf16.msra.mxu1 %v3689_v52 }
 0x529   : > { %2732 = vmatprep.subr.mxu1 %v3696_v54 }
 0x52c   : > { %2733 = vmatpush3.msra.mxu1 %v3696_v54 }
 0x52d   : > { %2735 = vmatmul.mubr.msk.f32.vlgmr.msra.gmra.mrb[2].mxu1 %vm223_vm0, %v1331_v43  ;;  %3104 = vmatprep.subr.bf16.mxu1 %v3551_v53 }
 0x52e   : > { %3106 = vmatpush3.bf16.msra.mxu1 %v3551_v53 }
 0x52f   : > { %3108 = vmatprep.subr.bf16.mxu1 %v3556_v55 }
 0x532   : > { %3110 = vmatpush3.bf16.msra.mxu1 %v3556_v55 }
 0x533   : > { %3112 = vmatprep.subr.bf16.mxu1 %v3568_v58 }
 0x536   : > { %3114 = vmatpush3.bf16.msra.mxu1 %v3568_v58 }
 0x537   : > { %3116 = vmatprep.subr.bf16.mxu1 %v3578_v61 }
 0x53a   : > { %3118 = vmatpush3.bf16.msra.mxu1 %v3578_v61 }
 0x53b   : > { %2816 = vmatprep.subr.mxu1 %v3590_v1 }
 0x53e   : > { %2817 = vmatpush3.msra.mxu1 %v3590_v1 }
 0x53f   : > { %3120 = vmatprep.subr.bf16.mxu1 %v3600_v7 }
 0x600   : > { %v2736_v45 = vpop.f32.mrb[2].mxu1 }
 0x601   : > { %v1425_v53 = vadd.f32 %v2736_v45, %v3716_v57  ;;  %v1413_v46 = vpop.f32.mrb[3].mxu1 }
 0x602   : > { %v1424_v55 = vadd.f32 %v3716_v57, %v1413_v46 }
 0x603   : > { %v1433_v56 = vadd.f32 %v1429_v50, %v1425_v53 }
 0x604   : > { %v1432_v58 = vadd.f32 %v1427_v51, %v1424_v55 }
 0x605   : > { %v1435_v59 = vmax.f32 %v1433_v56, 0.0 }
 0x606   : > { %v1434_v60 = vmax.f32 %v1432_v58, 0.0 }
 0x607   : > { %1440 = vrot.lane.b32.xlu1 %v1435_v59, %s3284_s10 }
 0x608   : > { %1438 = vrot.lane.b32.xlu0 %v1434_v60, %s3284_s10 }
 0x679   : > { %v1441_v61 = vpop.permute.xlu1 %1440 }
 0x67a   : > { %1445 = vst.msk [vmem:[#allocation2 + $0x9] sm:$0xff] %vm241_vm2, %v1441_v61  ;;  %v1439_v1 = vpop.permute.xlu0 %1438 }
 0x67b   : > { %1444 = vst.msk [vmem:[#allocation2 + $0x1] sm:$0xff] %vm241_vm2, %v1439_v1 }
 0x681   : > { %v1447_v0 = vld [vmem:[#allocation2 + $0x9] sm:$0xff] }
 0x682   : > { %v1446_v63 = vld [vmem:[#allocation2 + $0x1] sm:$0xff] }
 0x683   : > { %2755 = vmatprep.mubr.msk.f32.mxu0 %vm223_vm0, %v1446_v63  ;;  %v1448_v2 = vld [vmem:[#allocation2] sm:$0xff]  ;;  %v1449_v4 = vld [vmem:[#allocation2 + $0x8] sm:$0xff] }
 0x684   : > { %2756 = vmatmul.mubr.msk.f32.vlgmr.msra.gmra.mrb[4].mxu0 %vm223_vm0, %v1447_v0 }
 0x685   : > { %3074 = vmatpush3.bf16.msra.mxu0 %v3430_v18  ;;  %2776 = vmatprep.mubr.msk.f32.mxu0 %vm223_vm0, %v1448_v2  ;;  %v1630_v18 = vld [vmem:[#allocation2 + $0x2] sm:$0xff] }
 0x686   : > { %3076 = vmatprep.subr.bf16.mxu0 %v3444_v24 }
 0x689   : > { %3078 = vmatpush3.bf16.msra.mxu0 %v3444_v24  ;;  %v1631_v24 = vld [vmem:[#allocation2 + $0xa] sm:$0xff] }
 0x68a   : > { %3080 = vmatprep.subr.bf16.mxu0 %v3459_v29 }
 0x68d   : > { %3082 = vmatpush3.bf16.msra.mxu0 %v3459_v29 }
 0x68e   : > { %3084 = vmatprep.subr.bf16.mxu0 %v3469_v32 }
 0x691   : > { %3086 = vmatpush3.bf16.msra.mxu0 %v3469_v32 }
 0x692   : > { %2774 = vmatprep.subr.mxu0 %v3476_v33 }
 0x695   : > { %2775 = vmatpush3.msra.mxu0 %v3476_v33 }
 0x696   : > { %2777 = vmatmul.mubr.msk.f32.vlgmr.msra.gmra.mrb[4].mxu0 %vm223_vm0, %v1449_v4  ;;  %3088 = vmatprep.subr.bf16.mxu0 %v3492_v38 }
 0x697   : > { %3090 = vmatpush3.bf16.msra.mxu0 %v3492_v38  ;;  %2797 = vmatprep.mubr.msk.f32.mxu0 %vm223_vm0, %v1630_v18 }
 0x698   : > { %3092 = vmatprep.subr.bf16.mxu0 %v3494_v39 }
 0x69b   : > { %3094 = vmatpush3.bf16.msra.mxu0 %v3494_v39 }
 0x69c   : > { %3096 = vmatprep.subr.bf16.mxu0 %v3508_v44 }
 0x69f   : > { %3098 = vmatpush3.bf16.msra.mxu0 %v3508_v44 }
 0x6a0   : > { %3100 = vmatprep.subr.bf16.mxu0 %v3518_v47 }
 0x6a3   : > { %3102 = vmatpush3.bf16.msra.mxu0 %v3518_v47 }
 0x6a4   : > { %2795 = vmatprep.subr.mxu0 %v3525_v48 }
 0x6a7   : > { %2796 = vmatpush3.msra.mxu0 %v3525_v48 }
 0x6a8   : > { %2798 = vmatmul.mubr.msk.f32.vlgmr.msra.gmra.mrb[4].mxu0 %vm223_vm0, %v1631_v24 }
 0x77b   : > { %v2799_v29 = vpop.f32.mrb[4].mxu0 }
 0x77c   : > { %v1725_v32 = vadd.f32 %v2799_v29, %v3584_v62  ;;  %v1713_v33 = vpop.f32.mrb[5].mxu0 }
 0x77d   : > { %v1724_v38 = vadd.f32 %v3584_v62, %v1713_v33 }
 0x77e   : > { %v1727_v39 = vmax.f32 %v1725_v32, 0.0 }
 0x77f   : > { %v1726_v6 = vmax.f32 %v1724_v38, 0.0 }
 0x780   : > { %1732 = vrot.lane.b32.xlu1 %v1727_v39, %s3284_s10 }
 0x781   : > { %1730 = vrot.lane.b32.xlu0 %v1726_v6, %s3284_s10 }
 0x784   : > { %2020 = vrot.lane.b32.xlu1 %v1447_v0, %s3285_s30 }
 0x785   : > { %2018 = vrot.lane.b32.xlu0 %v1446_v63, %s3285_s30 }
 0x7f2   : > { %v1733_v44 = vpop.permute.xlu1 %1732 }
 0x7f3   : > { %1737 = vst.msk [vmem:[#allocation3 + $0x9] sm:$0xff] %vm241_vm2, %v1733_v44  ;;  %v1731_v47 = vpop.permute.xlu0 %1730 }
 0x7f4   : > { %1736 = vst.msk [vmem:[#allocation3 + $0x1] sm:$0xff] %vm241_vm2, %v1731_v47 }
 0x7fa   : > { %v1750_v62 = vld [vmem:[#allocation3 + $0x9] sm:$0xff] }
 0x7fb   : > { %v1749_v48 = vld [vmem:[#allocation3 + $0x1] sm:$0xff] }
 0x7fc   : > { %2818 = vmatprep.mubr.msk.f32.mxu1 %vm223_vm0, %v1749_v48  ;;  %v1738_v8 = vld [vmem:[#allocation3] sm:$0xff]  ;;  %v1739_v10 = vld [vmem:[#allocation3 + $0x8] sm:$0xff] }
 0x7fd   : > { %2819 = vmatmul.mubr.msk.f32.vlgmr.msra.gmra.mrb[4].mxu1 %vm223_vm0, %v1750_v62 }
 0x7fe   : > { %3122 = vmatpush3.bf16.msra.mxu1 %v3600_v7  ;;  %2839 = vmatprep.mubr.msk.f32.mxu1 %vm223_vm0, %v1738_v8  ;;  %v1922_v7 = vld [vmem:[#allocation3 + $0x2] sm:$0xff] }
 0x7ff   : > { %3124 = vmatprep.subr.bf16.mxu1 %v3618_v20 }
 0x802   : > { %3126 = vmatpush3.bf16.msra.mxu1 %v3618_v20  ;;  %v1923_v20 = vld [vmem:[#allocation3 + $0xa] sm:$0xff] }
 0x803   : > { %3128 = vmatprep.subr.bf16.mxu1 %v3630_v26 }
 0x806   : > { %3130 = vmatpush3.bf16.msra.mxu1 %v3630_v26 }
 0x807   : > { %3132 = vmatprep.subr.bf16.mxu1 %v3640_v30 }
 0x80a   : > { %3134 = vmatpush3.bf16.msra.mxu1 %v3640_v30 }
 0x80b   : > { %2837 = vmatprep.subr.mxu1 %v3647_v31 }
 0x80e   : > { %2838 = vmatpush3.msra.mxu1 %v3647_v31 }
 0x80f   : > { %2840 = vmatmul.mubr.msk.f32.vlgmr.msra.gmra.mrb[4].mxu1 %vm223_vm0, %v1739_v10  ;;  %3136 = vmatprep.subr.bf16.mxu1 %v3663_v40 }
 0x810   : > { %3138 = vmatpush3.bf16.msra.mxu1 %v3663_v40  ;;  %2860 = vmatprep.mubr.msk.f32.mxu1 %vm223_vm0, %v1922_v7  ;;  %v2021_v40 = vpop.permute.xlu1 %2020 }
 0x811   : > { %3140 = vmatprep.subr.bf16.mxu1 %v3665_v41 }
 0x814   : > { %3142 = vmatpush3.bf16.msra.mxu1 %v3665_v41 }
 0x815   : > { %3144 = vmatprep.subr.bf16.mxu1 %v3679_v49 }
 0x818   : > { %3146 = vmatpush3.bf16.msra.mxu1 %v3679_v49  ;;  %v2019_v49 = vpop.permute.xlu0 %2018 }
 0x819   : > { %3148 = vmatprep.subr.bf16.mxu1 %v3689_v52 }
 0x81c   : > { %3150 = vmatpush3.bf16.msra.mxu1 %v3689_v52 }
 0x81d   : > { %2858 = vmatprep.subr.mxu1 %v3696_v54 }
 0x820   : > { %2859 = vmatpush3.msra.mxu1 %v3696_v54 }
 0x821   : > { %2861 = vmatmul.mubr.msk.f32.vlgmr.msra.gmra.mrb[4].mxu1 %vm223_vm0, %v1923_v20 }
 0x8f4   : > { %v2862_v26 = vpop.f32.mrb[4].mxu1 }
 0x8f5   : > { %v2017_v30 = vadd.f32 %v2862_v26, %v3716_v57  ;;  %v2005_v31 = vpop.f32.mrb[5].mxu1 }
 0x8f6   : > { %v2016_v41 = vadd.f32 %v3716_v57, %v2005_v31 }
 0x8f7   : > { %v2025_v11 = vadd.f32 %v2021_v40, %v2017_v30 }
 0x8f8   : > { %v2024_v12 = vadd.f32 %v2019_v49, %v2016_v41 }
 0x8f9   : > { %v2027_v13 = vmax.f32 %v2025_v11, 0.0 }
 0x8fa   : > { %v2026_v52 = vmax.f32 %v2024_v12, 0.0 }
 0x8fb   : > { %2032 = vrot.lane.b32.xlu1 %v2027_v13, %s3284_s10 }
 0x8fc   : > { %2030 = vrot.lane.b32.xlu0 %v2026_v52, %s3284_s10 }
 0x96d   : > { %v2033_v54 = vpop.permute.xlu1 %2032 }
 0x96e   : > { %2037 = vst.msk [vmem:[#allocation2 + $0x9] sm:$0xff] %vm241_vm2, %v2033_v54  ;;  %v2031_v16 = vpop.permute.xlu0 %2030 }
 0x96f   : > { %2036 = vst.msk [vmem:[#allocation2 + $0x1] sm:$0xff] %vm241_vm2, %v2031_v16 }
 0x975   : > { %v2039_v17 = vld [vmem:[#allocation2 + $0x9] sm:$0xff] }
 0x976   : > { %2044 = vrot.lane.b32.xlu1 %v2039_v17, %s3285_s30  ;;  %v2038_v57 = vld [vmem:[#allocation2 + $0x1] sm:$0xff] }
 0x977   : > { %2042 = vrot.lane.b32.xlu0 %v2038_v57, %s3285_s30  ;;  %s3885_s30 = scalar_lea.sflag [#allocation5], %s215_s8 }
 0x9e8   : > { %v2045_v19 = vpop.permute.xlu1 %2044 }
 0x9e9   : > { %2050 = vst.msk [vmem:[%s217_s11 + $0x8] sm:$0xff] %vm2048_vm3, %v2045_v19  ;;  %v2043_v21 = vpop.permute.xlu0 %2042 }
 0x9ea   : > { %2049 = vst.msk [vmem:[%s217_s11] sm:$0xff] %vm2048_vm3, %v2043_v21 }
 0x9eb   : > { %3232 = shalt.err (!%p3229_p3)
}
 0x9ec   : > { %s3233_s25 = scalar_lea.hbm %s3883_s15, 256  ;;  %s3237_s7 = scalar_lea.hbm %s3931_s5, 512 }
 0x9ed   : > { %p3234_p4 = scmp.ne.s32.totalorder %s3883_s15, %s3233_s25  ;;  %p3238_p9 = scmp.lt.u32.totalorder %s3883_s15, %s3931_s5 }
 0x9ee   : > { %p3239_p10 = scmp.lt.u32.totalorder %s3237_s7, %s3233_s25  ;;  %p3241_p12 = scmp.lt.u32.totalorder %s3233_s25, %s3883_s15 }
 0x9ef   : > { %p3235_p7 = pnand %p3234_p4, %p3357_p5 }
 0x9f0   : > { %p3240_p11 = por %p3239_p10, %p3238_p9 }
 0x9f1   : > { %p3236_p8 = pneg %p3235_p7 }
 0x9f2   : > { %p3242_p13 = por %p3241_p12, %p3240_p11 }
 0x9f4   : > { %p3243_p0 = pnand %p3242_p13, %p3236_p8 }
 0x9f6   : > { %3246 = shalt.err (!%p3243_p0)
}
 0x9f7   : > { %s3287_s11 = smov 128   ;;  %s3288_s13 = smov 8  }
 0x9f8   : > { %3175 = dma.vmem_to_hbm [thread:$0]  (%p3357_p5), %s3878_s12, 256, %s3883_s15, %s3885_s30, %s3287_s11, %s3287_s11, %s3288_s13  }
 0x9f9 PF: > { %p3181_p1 = scmp.ge.s32.totalorder %s3281_s21, 2  ;;  %s2080_s10 = sand.u32 1, %s3269_s18  }
 0x9fa   : > { %s2081_s14 = scalar_lea.sflag [#allocation5], %s2080_s10 }
 0x9fb   : > { %p3178_p2 = pnand %p3181_p1, %p3361_p6 }
 0x9fd   : > { %3264 = dma.done.wait (!%p3178_p2), %s2081_s14, 256  }
 0x9fe   : > { %3266 = vsyncadd (!%p3178_p2), %s2081_s14, 4294967040  ;;  %p15_p3 = scmp.ge.s32.totalorder %s3344_s24, 4   ;;  %s3934_s18 = smov %s3273_s19 }
 0x9ff   : > { %s3935_s19 = smov %s3277_s20  ;;  %s3936_s20 = smov %s3355_s27 }
 0xa00   : > { %s3937_s21 = smov %s3344_s24  ;;  %17 = sbr.rel (!%p15_p3) target bundleno = 3 (0x3), region = 79 }
 0xa07   :  { %2086 = vsyncpa [#allocation5], 1 }
 0xa08   :  { %2088 = vsyncpa [#allocation5 + $0x1], 1 }

</bundles_post_ra>
